<compile_context>
chip_gen: v5e
topology: v5e:2x2
jax: 0.10.0
libtpu: 0.0.40
codegen_flags: <defaults>
</compile_context>

<pallas_src>
import functools
import math

import jax
import jax.numpy as jnp
import numpy as np
from jax import lax
from jax.experimental import pallas as pl
from jax.experimental.pallas import tpu as pltpu


def _attn_kernel(x_ref, wq_ref, bq_ref, wkv_ref, bkv_ref, wo_ref, bo_ref,
                 *rest, num_heads, d_k, d_model, tq, with_attn, with_bias):
    """Fused self-attention for one (batch, query-tile) grid step.

    Grid = (B, num_q_blocks).  Heads are an in-kernel (unrolled) loop.  K|V
    for the whole sequence are projected once per batch row (qi == 0) into a
    persistent bf16 VMEM scratch and reused by all query tiles of that row.
    """
    idx = 0
    bias_ref = None
    if with_bias:
        bias_ref = rest[idx]
        idx += 1
    out_ref = rest[idx]
    idx += 1
    attn_ref = None
    if with_attn:
        attn_ref = rest[idx]
        idx += 1
    kv_scratch, q_scratch, ctx_scratch = rest[idx], rest[idx + 1], rest[idx + 2]

    qi = pl.program_id(1)

    # ---- K|V projection for the full sequence: once per batch row ---------
    # Two [S,D]x[D,D] matmuls (instead of one [S,D]x[D,2D]) so the largest
    # live f32 value is [S, D]; results stored bf16 (MXU-ready, 2x less VMEM).
    @pl.when(qi == 0)
    def _():
        x_bf = x_ref[0].astype(jnp.bfloat16)                          # [S, D]
        k = (jnp.dot(x_bf, wkv_ref[:, 0:d_model],
                     preferred_element_type=jnp.float32)
             + bkv_ref[0:1, 0:d_model])                               # [S, D] f32
        kv_scratch[:, 0:d_model] = k.astype(jnp.bfloat16)
        v = (jnp.dot(x_bf, wkv_ref[:, d_model:2 * d_model],
                     preferred_element_type=jnp.float32)
             + bkv_ref[0:1, d_model:2 * d_model])                     # [S, D] f32
        kv_scratch[:, d_model:2 * d_model] = v.astype(jnp.bfloat16)

    # ---- Q projection for this query tile (1/sqrt(dk) folded into wq/bq) --
    # Query rows are sliced from the resident per-batch x block (no separate
    # x_q DMA); the result goes to a bf16 VMEM scratch and is ref-sliced per
    # head below, so no [tq, D] value is held live across the head loop.
    row0 = pl.multiple_of(qi * tq, tq)
    x_q = x_ref[0, pl.ds(row0, tq), :].astype(jnp.bfloat16)           # [tq, D]
    q = (jnp.dot(x_q, wq_ref[...], preferred_element_type=jnp.float32)
         + bq_ref[...])                                               # [tq, D] f32
    q_scratch[...] = q.astype(jnp.bfloat16)

    # ---- Per-head scaled dot-product attention (unrolled over heads) ------
    for h in range(num_heads):
        lo = h * d_k
        q_h = q_scratch[:, lo:lo + d_k]                               # [tq, dk] bf16
        k_h = kv_scratch[:, lo:lo + d_k]                              # [S,  dk] bf16

        # q @ k^T (scale already folded into q); bf16 operands, f32 accum.
        s = lax.dot_general(q_h, k_h, (((1,), (1,)), ((), ())),
                            preferred_element_type=jnp.float32)       # [tq, S]
        if bias_ref is not None:
            s = s + bias_ref[0].astype(jnp.float32)                   # additive mask
        s = s - jnp.max(s, axis=-1, keepdims=True)
        e = jnp.exp(s)
        denom = jnp.sum(e, axis=-1, keepdims=True)
        if attn_ref is not None:
            attn_h = e / denom                    # exact: externally visible output
            attn_ref[0, h] = attn_h.astype(attn_ref.dtype)
        else:
            attn_h = e * pl.reciprocal(denom, approx=True)            # EUP slot

        v_h = kv_scratch[:, d_model + lo:d_model + lo + d_k]          # [S, dk] bf16
        ctx_h = jnp.dot(attn_h.astype(jnp.bfloat16), v_h,
                        preferred_element_type=jnp.float32)           # [tq, dk]
        ctx_scratch[:, lo:lo + d_k] = ctx_h.astype(jnp.bfloat16)

    # ---- Output projection: single [tq, D] x [D, D] bf16 matmul -----------
    out = (jnp.dot(ctx_scratch[...], wo_ref[...],
                   preferred_element_type=jnp.float32) + bo_ref[...])
    out_ref[0] = out.astype(out_ref.dtype)


def _pick_q_block(seq_len, target):
    """Largest query tile dividing seq_len, <= target, preferring multiples
    of 16 (bf16 sublane tiling), falling back to multiples of 8, then S."""
    target = min(target, seq_len)
    if seq_len <= target:
        return seq_len
    for align in (16, 8):
        for t in range(target, align - 1, -1):
            if seq_len % t == 0 and t % align == 0:
                return t
    return seq_len  # fallback: no query tiling


def _vmem_capacity_bytes():
    try:
        return int(pltpu.get_tpu_info().vmem_capacity_bytes)
    except Exception:
        return 64 * 1024 * 1024  # safe lower bound (v7x per-TC VMEM)


def _estimate_vmem_bytes(tq, S, D, H, with_attn, with_bias):
    """Rough per-core VMEM footprint (scratch + double-buffered blocks)."""
    b = S * (2 * D) * 2                     # kv scratch (bf16)
    b += 2 * tq * D * 2                     # q + ctx scratches (bf16)
    b += 2 * (4 * D * D * 2 + 4 * D * 4)    # weights (bf16) + biases (f32), x2 bufs
    b += 2 * S * D * 4                      # x block (f32), x2 bufs
    b += 2 * tq * D * 4                     # out block (f32), x2 bufs
    if with_bias:
        b += 2 * tq * S * 2                 # additive-mask bias block (bf16)
    if with_attn:
        b += 2 * H * tq * S * 4             # attention-weight block
    return b


def self_attention(x, params, mask=None, *, return_attn_weights=True,
                   q_block=256, attn_weights_dtype=jnp.float32):
    """Pallas self-attention.  x: [B, S, D] float32.

    Returns (out [B, S, D], attn_weights [B, H, S, S] or None).
    """
    B, S, D = x.shape
    H = params["num_heads"]
    if D % H != 0:
        raise ValueError(f"d_model ({D}) must be divisible by num_heads ({H})")
    dk = D // H
    scale = 1.0 / math.sqrt(dk)

    # --- weight preprocessing: bf16 MXU operands, 1/sqrt(dk) folded into Q --
    wq = (params["wq"] * scale).astype(jnp.bfloat16)
    bq = (params["bq"] * scale).reshape(1, D).astype(jnp.float32)
    wkv = jnp.concatenate([params["wk"], params["wv"]], axis=1).astype(jnp.bfloat16)
    bkv = jnp.concatenate([params["bk"], params["bv"]]).reshape(1, 2 * D).astype(jnp.float32)
    wo = params["wo"].astype(jnp.bfloat16)
    bo = params["bo"].reshape(1, D).astype(jnp.float32)

    # --- additive mask bias (bf16): 0 = keep, -1e9 = masked -----------------
    # Matches masked_fill semantics post-softmax except for degenerate
    # fully-masked rows (reference yields uniform weights there).
    with_bias = mask is not None
    bias = None
    if with_bias:
        m = mask
        if m.ndim == 2:
            m = m[None, None, :, :]
        elif m.ndim == 3:
            m = m[:, None, :, :]
        if m.ndim != 4:
            raise ValueError("mask must have 2, 3 or 4 dims")
        if m.shape[1] != 1:
            raise ValueError("per-head masks are not supported")
        m = jnp.broadcast_to(m, (B, 1, S, S)).reshape(B, S, S)
        bias = jnp.where(m == 0, jnp.bfloat16(-1e9), jnp.bfloat16(0.0))

    # --- VMEM-aware query tile ----------------------------------------------
    vmem_cap = _vmem_capacity_bytes()
    vmem_limit = min((vmem_cap * 7) // 8, 112 * 1024 * 1024)
    tq = _pick_q_block(S, q_block)
    while (tq > 16 and
           _estimate_vmem_bytes(tq, S, D, H, return_attn_weights, with_bias)
           > (vmem_limit * 4) // 5):
        new_tq = _pick_q_block(S, max(tq // 2, 8))
        if new_tq >= tq:
            break
        tq = new_tq
    nq = S // tq
    grid = (B, nq)

    in_specs = [
        pl.BlockSpec((1, S, D), lambda b, qi: (b, 0, 0)),      # x (full seq, one batch)
        pl.BlockSpec((D, D), lambda b, qi: (0, 0)),            # wq (pre-scaled, bf16)
        pl.BlockSpec((1, D), lambda b, qi: (0, 0)),            # bq (pre-scaled, f32)
        pl.BlockSpec((D, 2 * D), lambda b, qi: (0, 0)),        # wk|wv fused (bf16)
        pl.BlockSpec((1, 2 * D), lambda b, qi: (0, 0)),        # bk|bv fused (f32)
        pl.BlockSpec((D, D), lambda b, qi: (0, 0)),            # wo (bf16)
        pl.BlockSpec((1, D), lambda b, qi: (0, 0)),            # bo (f32)
    ]
    inputs = [x, wq, bq, wkv, bkv, wo, bo]
    if with_bias:
        in_specs.append(pl.BlockSpec((1, tq, S), lambda b, qi: (b, qi, 0)))
        inputs.append(bias)

    out_specs = [pl.BlockSpec((1, tq, D), lambda b, qi: (b, qi, 0))]
    out_shapes = [jax.ShapeDtypeStruct((B, S, D), x.dtype)]
    if return_attn_weights:
        out_specs.append(pl.BlockSpec((1, H, tq, S), lambda b, qi: (b, 0, qi, 0)))
        out_shapes.append(jax.ShapeDtypeStruct((B, H, S, S), attn_weights_dtype))

    scratch_shapes = [
        pltpu.VMEM((S, 2 * D), jnp.bfloat16),   # K|V for the whole sequence
        pltpu.VMEM((tq, D), jnp.bfloat16),      # Q for this query tile
        pltpu.VMEM((tq, D), jnp.bfloat16),      # per-tile context (all heads)
    ]

    # Advisory cost estimate (helps XLA schedule around the custom call).
    flops = 8 * B * S * D * D + 4 * B * S * S * D
    transcendentals = B * H * S * S
    bytes_accessed = (B * S * D * x.dtype.itemsize        # x in
                      + 4 * D * D * 2 + 4 * D * 4         # weights + biases
                      + B * S * D * 4)                    # out
    if with_bias:
        bytes_accessed += B * S * S * 2
    if return_attn_weights:
        bytes_accessed += B * H * S * S * np.dtype(attn_weights_dtype).itemsize

    kernel = functools.partial(
        _attn_kernel, num_heads=H, d_k=dk, d_model=D, tq=tq,
        with_attn=return_attn_weights, with_bias=with_bias)

    results = pl.pallas_call(
        kernel,
        grid_spec=pltpu.PrefetchScalarGridSpec(
            num_scalar_prefetch=0,
            grid=grid,
            in_specs=in_specs,
            out_specs=out_specs,
            scratch_shapes=scratch_shapes,
        ),
        out_shape=out_shapes,
        compiler_params=pltpu.CompilerParams(
            # Batch axis parallel (megacore); query-tile axis sequential so
            # the once-per-batch K|V scratch written at qi==0 can be reused.
            dimension_semantics=("parallel", "arbitrary"),
            vmem_limit_bytes=int(vmem_limit),
        ),
        cost_estimate=pl.CostEstimate(
            flops=int(flops),
            transcendentals=int(transcendentals),
            bytes_accessed=int(bytes_accessed)),
    )(*inputs)

    if return_attn_weights:
        out, attn_w = results
        return out, attn_w
    return results[0], None


def _reference(x, params, mask):
    """Pure-JAX reference matching the PyTorch forward (dropout = identity)."""
    B, S, D = x.shape
    H = params["num_heads"]
    dk = D // H

    q = x @ params["wq"] + params["bq"]
    k = x @ params["wk"] + params["bk"]
    v = x @ params["wv"] + params["bv"]

    def split(t):
        return jnp.transpose(t.reshape(B, S, H, dk), (0, 2, 1, 3))

    q, k, v = split(q), split(k), split(v)
    scores = jnp.einsum("bhqd,bhkd->bhqk", q, k) / math.sqrt(dk)
    if mask is not None:
        scores = jnp.where(mask == 0, -1e9, scores)
    attn = jax.nn.softmax(scores, axis=-1)
    ctx = jnp.einsum("bhqk,bhkd->bhqd", attn, v)
    ctx = jnp.transpose(ctx, (0, 2, 1, 3)).reshape(B, S, D)
    out = ctx @ params["wo"] + params["bo"]
    return out, attn


def _make_params(key, D, H):
    keys = jax.random.split(key, 8)

    def w(k):
        return jax.random.normal(k, (D, D), dtype=jnp.float32) * 0.05

    def b(k):
        return jax.random.normal(k, (D,), dtype=jnp.float32) * 0.01

    return {
        "num_heads": H,
        "wq": w(keys[0]), "bq": b(keys[1]),
        "wk": w(keys[2]), "bk": b(keys[3]),
        "wv": w(keys[4]), "bv": b(keys[5]),
        "wo": w(keys[6]), "bo": b(keys[7]),
    }


def _run_case(key, B, S, D, H, q_block, use_mask=True):
    kp, kx, km = jax.random.split(key, 3)
    params = _make_params(kp, D, H)
    x = jax.random.normal(kx, (B, S, D), dtype=jnp.float32)
    if use_mask:
        # 0/1 mask [B, 1, S, S]; force the diagonal to 1 so no row is fully
        # masked (fully-masked rows are degenerate under masked_fill semantics).
        mask = (jax.random.uniform(km, (B, 1, S, S)) > 0.2).astype(jnp.float32)
        mask = jnp.maximum(mask, jnp.eye(S, dtype=jnp.float32)[None, None])
    else:
        mask = None

    out, attn = self_attention(x, params, mask, q_block=q_block)
    out = jax.block_until_ready(out)
    attn = jax.block_until_ready(attn)

    ref_out, ref_attn = _reference(x, params, mask)
    np.testing.assert_allclose(np.asarray(out), np.asarray(ref_out),
                               atol=1e-2, rtol=2e-2)
    np.testing.assert_allclose(np.asarray(attn), np.asarray(ref_attn),
                               atol=3e-3, rtol=2e-2)

    # out-only path (skips the O(B*H*S^2) attention-weights writeback and
    # uses the approx-reciprocal EUP normalization).
    out2, _ = self_attention(x, params, mask, return_attn_weights=False,
                             q_block=q_block)
    out2 = jax.block_until_ready(out2)
    np.testing.assert_allclose(np.asarray(out2), np.asarray(ref_out),
                               atol=1e-2, rtol=2e-2)


if __name__ == "__main__":
    root = jax.random.PRNGKey(0)
    k1, k2, k3 = jax.random.split(root, 3)
    # Small shapes consistent with the module (batch, seq, d_model, heads).
    _run_case(k1, B=2, S=8, D=32, H=4, q_block=256)                  # single query tile
    _run_case(k2, B=2, S=256, D=128, H=4, q_block=128)               # 2 query tiles / row
    _run_case(k3, B=2, S=8, D=32, H=4, q_block=256, use_mask=False)  # no-mask path
    print("KERNEL_OK")
</pallas_src>

<mosaic_0001>
module attributes {stable_mosaic.version = 11 : i64} {
  func.func @_attn_kernel(%arg0: i32, %arg1: i32, %arg2: memref<1x8x32xf32, #tpu.memory_space<vmem>>, %arg3: memref<32x32xbf16, #tpu.memory_space<vmem>>, %arg4: memref<1x32xf32, #tpu.memory_space<vmem>>, %arg5: memref<32x64xbf16, #tpu.memory_space<vmem>>, %arg6: memref<1x64xf32, #tpu.memory_space<vmem>>, %arg7: memref<32x32xbf16, #tpu.memory_space<vmem>>, %arg8: memref<1x32xf32, #tpu.memory_space<vmem>>, %arg9: memref<1x8x8xbf16, #tpu.memory_space<vmem>>, %arg10: memref<1x8x32xf32, #tpu.memory_space<vmem>>, %arg11: memref<1x4x8x8xf32, #tpu.memory_space<vmem>>, %arg12: memref<8x64xbf16, #tpu.memory_space<vmem>>, %arg13: memref<8x32xbf16, #tpu.memory_space<vmem>>, %arg14: memref<8x32xbf16, #tpu.memory_space<vmem>>) attributes {dimension_semantics = [#tpu.dimension_semantics<parallel>, #tpu.dimension_semantics<arbitrary>], iteration_bounds = array<i64: 2, 1>, scalar_prefetch = 0 : i64, scratch_operands = 3 : i64, tpu.core_type = #tpu.core_type<tc>, window_params = [{transform_indices = @transform_0, window_bounds = array<i64: 1, 8, 32>}, {pipeline_mode = #tpu.pipeline_mode<synchronous>, transform_indices = @transform_1, window_bounds = array<i64: 32, 32>}, {pipeline_mode = #tpu.pipeline_mode<synchronous>, transform_indices = @transform_2, window_bounds = array<i64: 1, 32>}, {pipeline_mode = #tpu.pipeline_mode<synchronous>, transform_indices = @transform_3, window_bounds = array<i64: 32, 64>}, {pipeline_mode = #tpu.pipeline_mode<synchronous>, transform_indices = @transform_4, window_bounds = array<i64: 1, 64>}, {pipeline_mode = #tpu.pipeline_mode<synchronous>, transform_indices = @transform_5, window_bounds = array<i64: 32, 32>}, {pipeline_mode = #tpu.pipeline_mode<synchronous>, transform_indices = @transform_6, window_bounds = array<i64: 1, 32>}, {transform_indices = @transform_7, window_bounds = array<i64: 1, 8, 8>}, {transform_indices = @transform_8, window_bounds = array<i64: 1, 8, 32>}, {transform_indices = @transform_9, window_bounds = array<i64: 1, 4, 8, 8>}]} {
    %c0_i32 = arith.constant 0 : i32
    %0 = arith.cmpi eq, %arg1, %c0_i32 : i32
    %1 = arith.extui %0 : i1 to i32
    %c0_i32_0 = arith.constant 0 : i32
    %2 = arith.cmpi ne, %1, %c0_i32_0 : i32
    scf.if %2 {
      %c0_84 = arith.constant 0 : index
      %c0_85 = arith.constant 0 : index
      %c0_86 = arith.constant 0 : index
      %121 = vector.load %arg2[%c0_84, %c0_85, %c0_86] : memref<1x8x32xf32, #tpu.memory_space<vmem>>, vector<1x8x32xf32>
      %122 = vector.shape_cast %121 : vector<1x8x32xf32> to vector<8x32xf32>
      %123 = arith.truncf %122 : vector<8x32xf32> to vector<8x32xbf16>
      %c0_87 = arith.constant 0 : index
      %c0_88 = arith.constant 0 : index
      %124 = vector.load %arg5[%c0_87, %c0_88] : memref<32x64xbf16, #tpu.memory_space<vmem>>, vector<32x32xbf16>
      %cst_89 = arith.constant dense<0.000000e+00> : vector<8x32xf32>
      %125 = tpu.matmul %123, %124, %cst_89 {dimension_numbers = #tpu.dot_dimension_numbers<[1], [0], [0], [1], [0, 0, 1, 1], [], []>} : vector<8x32xbf16>, vector<32x32xbf16>, vector<8x32xf32> -> vector<8x32xf32>
      %c0_90 = arith.constant 0 : index
      %c0_91 = arith.constant 0 : index
      %126 = vector.load %arg6[%c0_90, %c0_91] : memref<1x64xf32, #tpu.memory_space<vmem>>, vector<1x32xf32>
      %127 = vector.broadcast %126 : vector<1x32xf32> to vector<8x32xf32>
      %128 = arith.addf %125, %127 : vector<8x32xf32>
      %129 = arith.truncf %128 : vector<8x32xf32> to vector<8x32xbf16>
      %c0_92 = arith.constant 0 : index
      %c0_93 = arith.constant 0 : index
      %130 = vector.load %arg12[%c0_92, %c0_93] : memref<8x64xbf16, #tpu.memory_space<vmem>>, vector<8x32xbf16>
      tpu.vector_store %arg12[%c0_92, %c0_93], %129 {strides = array<i32>} : memref<8x64xbf16, #tpu.memory_space<vmem>>, vector<8x32xbf16>,
      %c0_94 = arith.constant 0 : index
      %c32_95 = arith.constant 32 : index
      %131 = vector.load %arg5[%c0_94, %c32_95] : memref<32x64xbf16, #tpu.memory_space<vmem>>, vector<32x32xbf16>
      %cst_96 = arith.constant dense<0.000000e+00> : vector<8x32xf32>
      %132 = tpu.matmul %123, %131, %cst_96 {dimension_numbers = #tpu.dot_dimension_numbers<[1], [0], [0], [1], [0, 0, 1, 1], [], []>} : vector<8x32xbf16>, vector<32x32xbf16>, vector<8x32xf32> -> vector<8x32xf32>
      %c0_97 = arith.constant 0 : index
      %c32_98 = arith.constant 32 : index
      %133 = vector.load %arg6[%c0_97, %c32_98] : memref<1x64xf32, #tpu.memory_space<vmem>>, vector<1x32xf32>
      %134 = vector.broadcast %133 : vector<1x32xf32> to vector<8x32xf32>
      %135 = arith.addf %132, %134 : vector<8x32xf32>
      %136 = arith.truncf %135 : vector<8x32xf32> to vector<8x32xbf16>
      %c0_99 = arith.constant 0 : index
      %c32_100 = arith.constant 32 : index
      %137 = vector.load %arg12[%c0_99, %c32_100] : memref<8x64xbf16, #tpu.memory_space<vmem>>, vector<8x32xbf16>
      tpu.vector_store %arg12[%c0_99, %c32_100], %136 {strides = array<i32>} : memref<8x64xbf16, #tpu.memory_space<vmem>>, vector<8x32xbf16>,
    } else {
    }
    %c8_i32 = arith.constant 8 : i32
    %3 = arith.muli %arg1, %c8_i32 : i32
    %4 = tpu.assume_multiple %3, 8 : i32
    %c0 = arith.constant 0 : index
    %5 = arith.index_cast %4 : i32 to index
    %c0_1 = arith.constant 0 : index
    %6 = vector.load %arg2[%c0, %5, %c0_1] : memref<1x8x32xf32, #tpu.memory_space<vmem>>, vector<1x8x32xf32>
    %7 = vector.shape_cast %6 : vector<1x8x32xf32> to vector<8x32xf32>
    %8 = arith.truncf %7 : vector<8x32xf32> to vector<8x32xbf16>
    %c0_2 = arith.constant 0 : index
    %c0_3 = arith.constant 0 : index
    %9 = vector.load %arg3[%c0_2, %c0_3] : memref<32x32xbf16, #tpu.memory_space<vmem>>, vector<32x32xbf16>
    %cst = arith.constant dense<0.000000e+00> : vector<8x32xf32>
    %10 = tpu.matmul %8, %9, %cst {dimension_numbers = #tpu.dot_dimension_numbers<[1], [0], [0], [1], [0, 0, 1, 1], [], []>} : vector<8x32xbf16>, vector<32x32xbf16>, vector<8x32xf32> -> vector<8x32xf32>
    %c0_4 = arith.constant 0 : index
    %c0_5 = arith.constant 0 : index
    %11 = vector.load %arg4[%c0_4, %c0_5] : memref<1x32xf32, #tpu.memory_space<vmem>>, vector<1x32xf32>
    %12 = vector.broadcast %11 : vector<1x32xf32> to vector<8x32xf32>
    %13 = arith.addf %10, %12 : vector<8x32xf32>
    %14 = arith.truncf %13 : vector<8x32xf32> to vector<8x32xbf16>
    %c0_6 = arith.constant 0 : index
    %c0_7 = arith.constant 0 : index
    %15 = vector.load %arg13[%c0_6, %c0_7] : memref<8x32xbf16, #tpu.memory_space<vmem>>, vector<8x32xbf16>
    tpu.vector_store %arg13[%c0_6, %c0_7], %14 {strides = array<i32>} : memref<8x32xbf16, #tpu.memory_space<vmem>>, vector<8x32xbf16>,
    %c0_8 = arith.constant 0 : index
    %c0_9 = arith.constant 0 : index
    %16 = vector.load %arg13[%c0_8, %c0_9] : memref<8x32xbf16, #tpu.memory_space<vmem>>, vector<8x8xbf16>
    %c0_10 = arith.constant 0 : index
    %c0_11 = arith.constant 0 : index
    %17 = vector.load %arg12[%c0_10, %c0_11] : memref<8x64xbf16, #tpu.memory_space<vmem>>, vector<8x8xbf16>
    %cst_12 = arith.constant dense<0.000000e+00> : vector<8x8xf32>
    %18 = tpu.matmul %16, %17, %cst_12 {dimension_numbers = #tpu.dot_dimension_numbers<[1], [1], [0], [0], [0, 0, 1, 0], [], []>} : vector<8x8xbf16>, vector<8x8xbf16>, vector<8x8xf32> -> vector<8x8xf32>
    %c0_13 = arith.constant 0 : index
    %c0_14 = arith.constant 0 : index
    %c0_15 = arith.constant 0 : index
    %19 = vector.load %arg9[%c0_13, %c0_14, %c0_15] : memref<1x8x8xbf16, #tpu.memory_space<vmem>>, vector<1x8x8xbf16>
    %20 = vector.shape_cast %19 : vector<1x8x8xbf16> to vector<8x8xbf16>
    %21 = arith.extf %20 : vector<8x8xbf16> to vector<8x8xf32>
    %22 = arith.addf %18, %21 : vector<8x8xf32>
    %cst_16 = arith.constant dense<0xFF800000> : vector<8xf32>
    %23 = vector.multi_reduction <maximumf>, %22, %cst_16 [1] : vector<8x8xf32> to vector<8xf32>
    %24 = vector.shape_cast %23 : vector<8xf32> to vector<8x1xf32>
    %25 = vector.broadcast %24 : vector<8x1xf32> to vector<8x8xf32>
    %26 = arith.subf %22, %25 : vector<8x8xf32>
    %27 = math.exp %26 : vector<8x8xf32>
    %cst_17 = arith.constant dense<0.000000e+00> : vector<8xf32>
    %28 = vector.multi_reduction <add>, %27, %cst_17 [1] : vector<8x8xf32> to vector<8xf32>
    %29 = vector.shape_cast %28 : vector<8xf32> to vector<8x1xf32>
    %30 = vector.broadcast %29 : vector<8x1xf32> to vector<8x8xf32>
    %31 = arith.divf %27, %30 : vector<8x8xf32>
    %c0_18 = arith.constant 0 : index
    %c0_19 = arith.constant 0 : index
    %c0_20 = arith.constant 0 : index
    %c0_21 = arith.constant 0 : index
    %32 = vector.load %arg11[%c0_18, %c0_19, %c0_20, %c0_21] : memref<1x4x8x8xf32, #tpu.memory_space<vmem>>, vector<1x1x8x8xf32>
    %33 = vector.shape_cast %32 : vector<1x1x8x8xf32> to vector<8x8xf32>
    %34 = vector.shape_cast %31 : vector<8x8xf32> to vector<1x1x8x8xf32>
    tpu.vector_store %arg11[%c0_18, %c0_19, %c0_20, %c0_21], %34 {strides = array<i32>} : memref<1x4x8x8xf32, #tpu.memory_space<vmem>>, vector<1x1x8x8xf32>,
    %c0_22 = arith.constant 0 : index
    %c32 = arith.constant 32 : index
    %35 = vector.load %arg12[%c0_22, %c32] : memref<8x64xbf16, #tpu.memory_space<vmem>>, vector<8x8xbf16>
    %36 = arith.truncf %31 : vector<8x8xf32> to vector<8x8xbf16>
    %cst_23 = arith.constant dense<0.000000e+00> : vector<8x8xf32>
    %37 = tpu.matmul %36, %35, %cst_23 {dimension_numbers = #tpu.dot_dimension_numbers<[1], [0], [0], [1], [0, 0, 1, 1], [], []>} : vector<8x8xbf16>, vector<8x8xbf16>, vector<8x8xf32> -> vector<8x8xf32>
    %38 = arith.truncf %37 : vector<8x8xf32> to vector<8x8xbf16>
    %c0_24 = arith.constant 0 : index
    %c0_25 = arith.constant 0 : index
    %39 = vector.load %arg14[%c0_24, %c0_25] : memref<8x32xbf16, #tpu.memory_space<vmem>>, vector<8x8xbf16>
    tpu.vector_store %arg14[%c0_24, %c0_25], %38 {strides = array<i32>} : memref<8x32xbf16, #tpu.memory_space<vmem>>, vector<8x8xbf16>,
    %c0_26 = arith.constant 0 : index
    %c8 = arith.constant 8 : index
    %40 = vector.load %arg13[%c0_26, %c8] : memref<8x32xbf16, #tpu.memory_space<vmem>>, vector<8x8xbf16>
    %c0_27 = arith.constant 0 : index
    %c8_28 = arith.constant 8 : index
    %41 = vector.load %arg12[%c0_27, %c8_28] : memref<8x64xbf16, #tpu.memory_space<vmem>>, vector<8x8xbf16>
    %cst_29 = arith.constant dense<0.000000e+00> : vector<8x8xf32>
    %42 = tpu.matmul %40, %41, %cst_29 {dimension_numbers = #tpu.dot_dimension_numbers<[1], [1], [0], [0], [0, 0, 1, 0], [], []>} : vector<8x8xbf16>, vector<8x8xbf16>, vector<8x8xf32> -> vector<8x8xf32>
    %c0_30 = arith.constant 0 : index
    %c0_31 = arith.constant 0 : index
    %c0_32 = arith.constant 0 : index
    %43 = vector.load %arg9[%c0_30, %c0_31, %c0_32] : memref<1x8x8xbf16, #tpu.memory_space<vmem>>, vector<1x8x8xbf16>
    %44 = vector.shape_cast %43 : vector<1x8x8xbf16> to vector<8x8xbf16>
    %45 = arith.extf %44 : vector<8x8xbf16> to vector<8x8xf32>
    %46 = arith.addf %42, %45 : vector<8x8xf32>
    %cst_33 = arith.constant dense<0xFF800000> : vector<8xf32>
    %47 = vector.multi_reduction <maximumf>, %46, %cst_33 [1] : vector<8x8xf32> to vector<8xf32>
    %48 = vector.shape_cast %47 : vector<8xf32> to vector<8x1xf32>
    %49 = vector.broadcast %48 : vector<8x1xf32> to vector<8x8xf32>
    %50 = arith.subf %46, %49 : vector<8x8xf32>
    %51 = math.exp %50 : vector<8x8xf32>
    %cst_34 = arith.constant dense<0.000000e+00> : vector<8xf32>
    %52 = vector.multi_reduction <add>, %51, %cst_34 [1] : vector<8x8xf32> to vector<8xf32>
    %53 = vector.shape_cast %52 : vector<8xf32> to vector<8x1xf32>
    %54 = vector.broadcast %53 : vector<8x1xf32> to vector<8x8xf32>
    %55 = arith.divf %51, %54 : vector<8x8xf32>
    %c0_35 = arith.constant 0 : index
    %c1 = arith.constant 1 : index
    %c0_36 = arith.constant 0 : index
    %c0_37 = arith.constant 0 : index
    %56 = vector.load %arg11[%c0_35, %c1, %c0_36, %c0_37] : memref<1x4x8x8xf32, #tpu.memory_space<vmem>>, vector<1x1x8x8xf32>
    %57 = vector.shape_cast %56 : vector<1x1x8x8xf32> to vector<8x8xf32>
    %58 = vector.shape_cast %55 : vector<8x8xf32> to vector<1x1x8x8xf32>
    tpu.vector_store %arg11[%c0_35, %c1, %c0_36, %c0_37], %58 {strides = array<i32>} : memref<1x4x8x8xf32, #tpu.memory_space<vmem>>, vector<1x1x8x8xf32>,
    %c0_38 = arith.constant 0 : index
    %c40 = arith.constant 40 : index
    %59 = vector.load %arg12[%c0_38, %c40] : memref<8x64xbf16, #tpu.memory_space<vmem>>, vector<8x8xbf16>
    %60 = arith.truncf %55 : vector<8x8xf32> to vector<8x8xbf16>
    %cst_39 = arith.constant dense<0.000000e+00> : vector<8x8xf32>
    %61 = tpu.matmul %60, %59, %cst_39 {dimension_numbers = #tpu.dot_dimension_numbers<[1], [0], [0], [1], [0, 0, 1, 1], [], []>} : vector<8x8xbf16>, vector<8x8xbf16>, vector<8x8xf32> -> vector<8x8xf32>
    %62 = arith.truncf %61 : vector<8x8xf32> to vector<8x8xbf16>
    %c0_40 = arith.constant 0 : index
    %c8_41 = arith.constant 8 : index
    %63 = vector.load %arg14[%c0_40, %c8_41] : memref<8x32xbf16, #tpu.memory_space<vmem>>, vector<8x8xbf16>
    tpu.vector_store %arg14[%c0_40, %c8_41], %62 {strides = array<i32>} : memref<8x32xbf16, #tpu.memory_space<vmem>>, vector<8x8xbf16>,
    %c0_42 = arith.constant 0 : index
    %c16 = arith.constant 16 : index
    %64 = vector.load %arg13[%c0_42, %c16] : memref<8x32xbf16, #tpu.memory_space<vmem>>, vector<8x8xbf16>
    %c0_43 = arith.constant 0 : index
    %c16_44 = arith.constant 16 : index
    %65 = vector.load %arg12[%c0_43, %c16_44] : memref<8x64xbf16, #tpu.memory_space<vmem>>, vector<8x8xbf16>
    %cst_45 = arith.constant dense<0.000000e+00> : vector<8x8xf32>
    %66 = tpu.matmul %64, %65, %cst_45 {dimension_numbers = #tpu.dot_dimension_numbers<[1], [1], [0], [0], [0, 0, 1, 0], [], []>} : vector<8x8xbf16>, vector<8x8xbf16>, vector<8x8xf32> -> vector<8x8xf32>
    %c0_46 = arith.constant 0 : index
    %c0_47 = arith.constant 0 : index
    %c0_48 = arith.constant 0 : index
    %67 = vector.load %arg9[%c0_46, %c0_47, %c0_48] : memref<1x8x8xbf16, #tpu.memory_space<vmem>>, vector<1x8x8xbf16>
    %68 = vector.shape_cast %67 : vector<1x8x8xbf16> to vector<8x8xbf16>
    %69 = arith.extf %68 : vector<8x8xbf16> to vector<8x8xf32>
    %70 = arith.addf %66, %69 : vector<8x8xf32>
    %cst_49 = arith.constant dense<0xFF800000> : vector<8xf32>
    %71 = vector.multi_reduction <maximumf>, %70, %cst_49 [1] : vector<8x8xf32> to vector<8xf32>
    %72 = vector.shape_cast %71 : vector<8xf32> to vector<8x1xf32>
    %73 = vector.broadcast %72 : vector<8x1xf32> to vector<8x8xf32>
    %74 = arith.subf %70, %73 : vector<8x8xf32>
    %75 = math.exp %74 : vector<8x8xf32>
    %cst_50 = arith.constant dense<0.000000e+00> : vector<8xf32>
    %76 = vector.multi_reduction <add>, %75, %cst_50 [1] : vector<8x8xf32> to vector<8xf32>
    %77 = vector.shape_cast %76 : vector<8xf32> to vector<8x1xf32>
    %78 = vector.broadcast %77 : vector<8x1xf32> to vector<8x8xf32>
    %79 = arith.divf %75, %78 : vector<8x8xf32>
    %c0_51 = arith.constant 0 : index
    %c2 = arith.constant 2 : index
    %c0_52 = arith.constant 0 : index
    %c0_53 = arith.constant 0 : index
    %80 = vector.load %arg11[%c0_51, %c2, %c0_52, %c0_53] : memref<1x4x8x8xf32, #tpu.memory_space<vmem>>, vector<1x1x8x8xf32>
    %81 = vector.shape_cast %80 : vector<1x1x8x8xf32> to vector<8x8xf32>
    %82 = vector.shape_cast %79 : vector<8x8xf32> to vector<1x1x8x8xf32>
    tpu.vector_store %arg11[%c0_51, %c2, %c0_52, %c0_53], %82 {strides = array<i32>} : memref<1x4x8x8xf32, #tpu.memory_space<vmem>>, vector<1x1x8x8xf32>,
    %c0_54 = arith.constant 0 : index
    %c48 = arith.constant 48 : index
    %83 = vector.load %arg12[%c0_54, %c48] : memref<8x64xbf16, #tpu.memory_space<vmem>>, vector<8x8xbf16>
    %84 = arith.truncf %79 : vector<8x8xf32> to vector<8x8xbf16>
    %cst_55 = arith.constant dense<0.000000e+00> : vector<8x8xf32>
    %85 = tpu.matmul %84, %83, %cst_55 {dimension_numbers = #tpu.dot_dimension_numbers<[1], [0], [0], [1], [0, 0, 1, 1], [], []>} : vector<8x8xbf16>, vector<8x8xbf16>, vector<8x8xf32> -> vector<8x8xf32>
    %86 = arith.truncf %85 : vector<8x8xf32> to vector<8x8xbf16>
    %c0_56 = arith.constant 0 : index
    %c16_57 = arith.constant 16 : index
    %87 = vector.load %arg14[%c0_56, %c16_57] : memref<8x32xbf16, #tpu.memory_space<vmem>>, vector<8x8xbf16>
    tpu.vector_store %arg14[%c0_56, %c16_57], %86 {strides = array<i32>} : memref<8x32xbf16, #tpu.memory_space<vmem>>, vector<8x8xbf16>,
    %c0_58 = arith.constant 0 : index
    %c24 = arith.constant 24 : index
    %88 = vector.load %arg13[%c0_58, %c24] : memref<8x32xbf16, #tpu.memory_space<vmem>>, vector<8x8xbf16>
    %c0_59 = arith.constant 0 : index
    %c24_60 = arith.constant 24 : index
    %89 = vector.load %arg12[%c0_59, %c24_60] : memref<8x64xbf16, #tpu.memory_space<vmem>>, vector<8x8xbf16>
    %cst_61 = arith.constant dense<0.000000e+00> : vector<8x8xf32>
    %90 = tpu.matmul %88, %89, %cst_61 {dimension_numbers = #tpu.dot_dimension_numbers<[1], [1], [0], [0], [0, 0, 1, 0], [], []>} : vector<8x8xbf16>, vector<8x8xbf16>, vector<8x8xf32> -> vector<8x8xf32>
    %c0_62 = arith.constant 0 : index
    %c0_63 = arith.constant 0 : index
    %c0_64 = arith.constant 0 : index
    %91 = vector.load %arg9[%c0_62, %c0_63, %c0_64] : memref<1x8x8xbf16, #tpu.memory_space<vmem>>, vector<1x8x8xbf16>
    %92 = vector.shape_cast %91 : vector<1x8x8xbf16> to vector<8x8xbf16>
    %93 = arith.extf %92 : vector<8x8xbf16> to vector<8x8xf32>
    %94 = arith.addf %90, %93 : vector<8x8xf32>
    %cst_65 = arith.constant dense<0xFF800000> : vector<8xf32>
    %95 = vector.multi_reduction <maximumf>, %94, %cst_65 [1] : vector<8x8xf32> to vector<8xf32>
    %96 = vector.shape_cast %95 : vector<8xf32> to vector<8x1xf32>
    %97 = vector.broadcast %96 : vector<8x1xf32> to vector<8x8xf32>
    %98 = arith.subf %94, %97 : vector<8x8xf32>
    %99 = math.exp %98 : vector<8x8xf32>
    %cst_66 = arith.constant dense<0.000000e+00> : vector<8xf32>
    %100 = vector.multi_reduction <add>, %99, %cst_66 [1] : vector<8x8xf32> to vector<8xf32>
    %101 = vector.shape_cast %100 : vector<8xf32> to vector<8x1xf32>
    %102 = vector.broadcast %101 : vector<8x1xf32> to vector<8x8xf32>
    %103 = arith.divf %99, %102 : vector<8x8xf32>
    %c0_67 = arith.constant 0 : index
    %c3 = arith.constant 3 : index
    %c0_68 = arith.constant 0 : index
    %c0_69 = arith.constant 0 : index
    %104 = vector.load %arg11[%c0_67, %c3, %c0_68, %c0_69] : memref<1x4x8x8xf32, #tpu.memory_space<vmem>>, vector<1x1x8x8xf32>
    %105 = vector.shape_cast %104 : vector<1x1x8x8xf32> to vector<8x8xf32>
    %106 = vector.shape_cast %103 : vector<8x8xf32> to vector<1x1x8x8xf32>
    tpu.vector_store %arg11[%c0_67, %c3, %c0_68, %c0_69], %106 {strides = array<i32>} : memref<1x4x8x8xf32, #tpu.memory_space<vmem>>, vector<1x1x8x8xf32>,
    %c0_70 = arith.constant 0 : index
    %c56 = arith.constant 56 : index
    %107 = vector.load %arg12[%c0_70, %c56] : memref<8x64xbf16, #tpu.memory_space<vmem>>, vector<8x8xbf16>
    %108 = arith.truncf %103 : vector<8x8xf32> to vector<8x8xbf16>
    %cst_71 = arith.constant dense<0.000000e+00> : vector<8x8xf32>
    %109 = tpu.matmul %108, %107, %cst_71 {dimension_numbers = #tpu.dot_dimension_numbers<[1], [0], [0], [1], [0, 0, 1, 1], [], []>} : vector<8x8xbf16>, vector<8x8xbf16>, vector<8x8xf32> -> vector<8x8xf32>
    %110 = arith.truncf %109 : vector<8x8xf32> to vector<8x8xbf16>
    %c0_72 = arith.constant 0 : index
    %c24_73 = arith.constant 24 : index
    %111 = vector.load %arg14[%c0_72, %c24_73] : memref<8x32xbf16, #tpu.memory_space<vmem>>, vector<8x8xbf16>
    tpu.vector_store %arg14[%c0_72, %c24_73], %110 {strides = array<i32>} : memref<8x32xbf16, #tpu.memory_space<vmem>>, vector<8x8xbf16>,
    %c0_74 = arith.constant 0 : index
    %c0_75 = arith.constant 0 : index
    %112 = vector.load %arg14[%c0_74, %c0_75] : memref<8x32xbf16, #tpu.memory_space<vmem>>, vector<8x32xbf16>
    %c0_76 = arith.constant 0 : index
    %c0_77 = arith.constant 0 : index
    %113 = vector.load %arg7[%c0_76, %c0_77] : memref<32x32xbf16, #tpu.memory_space<vmem>>, vector<32x32xbf16>
    %cst_78 = arith.constant dense<0.000000e+00> : vector<8x32xf32>
    %114 = tpu.matmul %112, %113, %cst_78 {dimension_numbers = #tpu.dot_dimension_numbers<[1], [0], [0], [1], [0, 0, 1, 1], [], []>} : vector<8x32xbf16>, vector<32x32xbf16>, vector<8x32xf32> -> vector<8x32xf32>
    %c0_79 = arith.constant 0 : index
    %c0_80 = arith.constant 0 : index
    %115 = vector.load %arg8[%c0_79, %c0_80] : memref<1x32xf32, #tpu.memory_space<vmem>>, vector<1x32xf32>
    %116 = vector.broadcast %115 : vector<1x32xf32> to vector<8x32xf32>
    %117 = arith.addf %114, %116 : vector<8x32xf32>
    %c0_81 = arith.constant 0 : index
    %c0_82 = arith.constant 0 : index
    %c0_83 = arith.constant 0 : index
    %118 = vector.load %arg10[%c0_81, %c0_82, %c0_83] : memref<1x8x32xf32, #tpu.memory_space<vmem>>, vector<1x8x32xf32>
    %119 = vector.shape_cast %118 : vector<1x8x32xf32> to vector<8x32xf32>
    %120 = vector.shape_cast %117 : vector<8x32xf32> to vector<1x8x32xf32>
    tpu.vector_store %arg10[%c0_81, %c0_82, %c0_83], %120 {strides = array<i32>} : memref<1x8x32xf32, #tpu.memory_space<vmem>>, vector<1x8x32xf32>,
    return
  }
  func.func @transform_0(%arg0: i32, %arg1: i32) -> (i32, i32, i32) {
    %c0_i32 = arith.constant 0 : i32
    %c0_i32_0 = arith.constant 0 : i32
    %c0_i32_1 = arith.constant 0 : i32
    return %arg0, %c0_i32, %c0_i32_0 : i32, i32, i32
  }
  func.func @transform_1(%arg0: i32, %arg1: i32) -> (i32, i32) {
    %c0_i32 = arith.constant 0 : i32
    %c0_i32_0 = arith.constant 0 : i32
    %c0_i32_1 = arith.constant 0 : i32
    return %c0_i32, %c0_i32_0 : i32, i32
  }
  func.func @transform_2(%arg0: i32, %arg1: i32) -> (i32, i32) {
    %c0_i32 = arith.constant 0 : i32
    %c0_i32_0 = arith.constant 0 : i32
    %c0_i32_1 = arith.constant 0 : i32
    return %c0_i32, %c0_i32_0 : i32, i32
  }
  func.func @transform_3(%arg0: i32, %arg1: i32) -> (i32, i32) {
    %c0_i32 = arith.constant 0 : i32
    %c0_i32_0 = arith.constant 0 : i32
    %c0_i32_1 = arith.constant 0 : i32
    return %c0_i32, %c0_i32_0 : i32, i32
  }
  func.func @transform_4(%arg0: i32, %arg1: i32) -> (i32, i32) {
    %c0_i32 = arith.constant 0 : i32
    %c0_i32_0 = arith.constant 0 : i32
    %c0_i32_1 = arith.constant 0 : i32
    return %c0_i32, %c0_i32_0 : i32, i32
  }
  func.func @transform_5(%arg0: i32, %arg1: i32) -> (i32, i32) {
    %c0_i32 = arith.constant 0 : i32
    %c0_i32_0 = arith.constant 0 : i32
    %c0_i32_1 = arith.constant 0 : i32
    return %c0_i32, %c0_i32_0 : i32, i32
  }
  func.func @transform_6(%arg0: i32, %arg1: i32) -> (i32, i32) {
    %c0_i32 = arith.constant 0 : i32
    %c0_i32_0 = arith.constant 0 : i32
    %c0_i32_1 = arith.constant 0 : i32
    return %c0_i32, %c0_i32_0 : i32, i32
  }
  func.func @transform_7(%arg0: i32, %arg1: i32) -> (i32, i32, i32) {
    %c0_i32 = arith.constant 0 : i32
    %c0_i32_0 = arith.constant 0 : i32
    return %arg0, %arg1, %c0_i32 : i32, i32, i32
  }
  func.func @transform_8(%arg0: i32, %arg1: i32) -> (i32, i32, i32) {
    %c0_i32 = arith.constant 0 : i32
    %c0_i32_0 = arith.constant 0 : i32
    return %arg0, %arg1, %c0_i32 : i32, i32, i32
  }
  func.func @transform_9(%arg0: i32, %arg1: i32) -> (i32, i32, i32, i32) {
    %c0_i32 = arith.constant 0 : i32
    %c0_i32_0 = arith.constant 0 : i32
    %c0_i32_1 = arith.constant 0 : i32
    return %arg0, %c0_i32, %arg1, %c0_i32_0 : i32, i32, i32, i32
  }
}

</mosaic_0001>

<bundles_post_ra>
// kernel: tpu_custom_call.1
= control target key start
LH: loop header
LB: loop body
LE: loop exit
PB: predicated region body
PF: predicated region fallthrough
CT: control target
= control target key end

     0   :  { %s2059_s0 = inlined_call_operand.hbm [shape: f32[2,8,32], index: 0, kind: input, shape index: {}]   ;;  %s2060_s1 = inlined_call_operand.hbm [shape: bf16[32,32], index: 1, kind: input, shape index: {}]   ;;  %s2061_s2 = inlined_call_operand.vmem [shape: f32[1,32], index: 2, kind: input, shape index: {}]   ;;  %s2062_s3 = inlined_call_operand.hbm [shape: bf16[32,64], index: 3, kind: input, shape index: {}]   ;;  %s2063_s4 = inlined_call_operand.vmem [shape: f32[1,64], index: 4, kind: input, shape index: {}]   ;;  %s2064_s5 = inlined_call_operand.hbm [shape: bf16[32,32], index: 5, kind: input, shape index: {}]   ;;  %s2065_s6 = inlined_call_operand.vmem [shape: f32[1,32], index: 6, kind: input, shape index: {}]   ;;  %s2066_s7 = inlined_call_operand.hbm [shape: bf16[2,8,8], index: 7, kind: input, shape index: {}]   ;;  %s2067_s8 = inlined_call_operand.hbm [shape: f32[2,8,32], index: 8, kind: output, shape index: {0}]   ;;  %s2068_s9 = inlined_call_operand.hbm [shape: f32[2,4,8,8], index: 9, kind: output, shape index: {1}]  }
   0x1   :  { %2078 = sst [smem:[#allocation28_spill]] %s2059_s0 }
   0x2   :  { %2079 = sst [smem:[#allocation29_spill]] %s2060_s1 }
   0x3   :  { %2080 = sst [smem:[#allocation30_spill]] %s2062_s3 }
   0x4   :  { %2081 = sst [smem:[#allocation31_spill]] %s2065_s6 }
   0x5   :  { %2082 = sst [smem:[#allocation32_spill]] %s2067_s8 }
   0x6   :  { %15 = vsyncpa [#allocation6], 0 }
   0x7   :  { %17 = vsyncpa [#allocation6 + $0x1], 0 }
   0x8   :  { %18 = vsyncpa [#allocation9], 0 }
   0x9   :  { %19 = vsyncpa [#allocation12], 0 }
   0xa   :  { %20 = vsyncpa [#allocation7], 0 }
   0xb   :  { %22 = vsyncpa [#allocation7 + $0x1], 0 }
   0xc   :  { %23 = vsyncpa [#allocation16], 0 }
   0xd   :  { %25 = vsyncpa [#allocation16 + $0x1], 0  ;;  %s1766_s30 = smov 0   ;;  %s1768_s10 = smov 0  }
   0xe   :  { %s1770_s11 = smov 0   ;;  %s1772_s12 = smov 0  }
   0xf   :  { %s1774_s13 = smov 0   ;;  %s1776_s14 = smov 0  }
  0x10 LB: > { %2083 = sst [smem:[#allocation23_spill]] %s1677_s30  ;;  %s1797_s15 = sadd.s32 4294967295, %s1697_s14   ;;  %s1697_s14 = sphi %s1776_s14, %s31_s14   ;;  %s1693_s13 = sphi %s1774_s13, %s2111_s13   ;;  %s1689_s12 = sphi %s1772_s12, %s2110_s12   ;;  %s1685_s11 = sphi %s1770_s11, %s2106_s11   ;;  %s1681_s10 = sphi %s1768_s10, %s2109_s10   ;;  %s1677_s30 = sphi %s1766_s30, %s2108_s30  }
  0x11   : > { %2084 = sst [smem:[#allocation24_spill]] %s1685_s11  ;;  %p1204_p0 = scmp.ge.s32.totalorder %s1697_s14, 1 }
  0x12   : > { %p64_p1 = scmp.eq.s32.totalorder %s1797_s15, 0  ;;  %p284_p2 = scmp.lt.s32.totalorder %s1697_s14, 3 }
  0x13   : > { %s2085_s1 = sld [smem:[#allocation29_spill]]  ;;  %s1699_s20 = smov [#allocation8]  }
  0x14   : > { %p1805_p3 = pnand %p1204_p0, %p284_p2  ;;  %s297_s21 = sshll.u32 %s1699_s20, 4  ;;  %s298_s21 = int_to_ptr.vmem [resolvable:$true] %s297_s21 }
  0x15   : > { %p1208_p6 = scmp.ge.s32.totalorder %s1697_s14, 2  ;;  %s2069_s23 = smov 64  }
  0x16   : > { %p1304_p4 = pneg %p1805_p3  ;;  %s2071_s24 = smov 4  }
  0x17   : > { %s1203_s25 = sadd.s32 4294967294, %s1697_s14   ;;  %s43_s26 = sadd.s32 1, %s1693_s13 }
  0x18   : > { %p1813_p5 = pnand %p1304_p4, %p64_p1  ;;  %s50_s27 = sadd.s32 1, %s1685_s11 }
  0x19   : > { %s295_s18 = sshll.u32 %s2085_s1, 4  ;;  %p45_p7 = scmp.ge.s32.totalorder %s43_s26, 2  ;;  %s296_s18 = int_to_ptr.hbm [resolvable:$true] %s295_s18 }
  0x1a   : > { %1307 = dma.hbm_to_vmem [thread:$0]  (!%p1813_p5), %s296_s18, 256, %s298_s21, [#allocation9], %s2069_s23, %s2069_s23, %s2071_s24  }
  0x1b   : > { %p57_p8 = scmp.ne.s32.totalorder %s1685_s11, %s1681_s10  ;;  %p58_p9 = scmp.eq.s32.totalorder %s1697_s14, 0 }
  0x1c   : > { %p63_p10 = scmp.ne.s32.totalorder %s1681_s10, %s1677_s30  ;;  %s2113_s26 = smov (%p45_p7, %s43_s26), 0 }
  0x1d   : > { %2088 = sst [smem:[#allocation25_spill]] %s2113_s26  ;;  %p1833_p11 = por %p58_p9, %p57_p8 }
  0x1e   : > { %p1839_p12 = por %p64_p1, %p63_p10  ;;  %s47_s16 = ssub.s32 %s1693_s13, %s2113_s26 }
  0x1f   : > { %p243_p13 = scmp.eq.s32.totalorder %s1797_s15, 1  ;;  %p48_p0 = scmp.eq.s32.totalorder %s47_s16, 0 }
  0x20   : > { %p249_p2 = scmp.eq.s32.totalorder %s1203_s25, 1  ;;  %p1331_p7 = scmp.lt.s32.totalorder %s1697_s14, 2 }
  0x21   : > { %p1846_p4 = por %p243_p13, %p57_p8  ;;  %s348_s21 = sand.u32 1, %s1697_s14  }
  0x22   : > { %s1852_s18 = scalar_select %p48_p0, %s1685_s11, %s50_s27  }
  0x23   : > { %p1854_p9 = por %p249_p2, %p63_p10  ;;  %s350_s23 = sand.u32 1, %s1685_s11  }
  0x24   : > { %2092 = sst [smem:[#allocation26_spill]] %s1852_s18  ;;  %s1209_s24 = sshll.u32 %s350_s23, 3 }
  0x25   : > { %s2093_s20 = scalar_select %p1854_p9, 1, 0 }
  0x26   : > { %s1210_s1 = sshll.u32 %s1693_s13, 3  ;;  %s2095_s0 = sld [smem:[#allocation28_spill]] }
  0x27   : > { %2094 = sst [smem:[#allocation27_spill]] %s2093_s20  ;;  %s352_s6 = scalar_lea.vmem [#allocation5], %s1209_s24 }
  0x28   : > { %s360_s8 = sshll.u32 %s352_s6, 4  ;;  %p1868_p8 = pnand %p1331_p7, %p1833_p11  ;;  %s361_s8 = int_to_ptr.vmem [resolvable:$true] %s360_s8 }
  0x29   : > { %s1211_s18 = sshll.u32 %s350_s23, 2  ;;  %s2097_s3 = sld [smem:[#allocation30_spill]] }
  0x2a   : > { %s1702_s6 = smov [#allocation10]   ;;  %s329_s16 = sshll.u32 %s2064_s5, 4  ;;  %s330_s16 = int_to_ptr.hbm [resolvable:$true] %s329_s16 }
  0x2b   : > { %s314_s24 = sshll.u32 %s1702_s6, 4  ;;  %s2098_s23 = smov 4   ;;  %s315_s24 = int_to_ptr.vmem [resolvable:$true] %s314_s24 }
  0x2c   : > { %s356_s30 = scalar_lea.hbm %s2095_s0, %s1210_s1  ;;  %s2099_s0 = smov 64  }
  0x2d   : > { %s358_s25 = sshll.u32 %s356_s30, 4  ;;  %s349_s30 = scalar_lea.sflag [#allocation6], %s348_s21  ;;  %s359_s25 = int_to_ptr.hbm [resolvable:$true] %s358_s25 }
  0x2e   : > { %1317 = dma.hbm_to_vmem [thread:$0]  (!%p1868_p8), %s359_s25, 128, %s361_s8, %s349_s30  }
  0x2f   : > { %s312_s1 = sshll.u32 %s2097_s3, 4  ;;  %s1703_s11 = smov [#allocation11]   ;;  %s313_s1 = int_to_ptr.hbm [resolvable:$true] %s312_s1 }
  0x30   : > { %1310 = dma.hbm_to_vmem [thread:$0]  (!%p1813_p5), %s313_s1, 256, %s315_s24, [#allocation9], %s2099_s0, %s2099_s0, %s2098_s23  }
  0x31   : > { %s331_s20 = sshll.u32 %s1703_s11, 4  ;;  %s1212_s3 = sshll.u32 %s1693_s13, 2  ;;  %s332_s20 = int_to_ptr.vmem [resolvable:$true] %s331_s20 }
  0x32   : > { %s376_s25 = scalar_lea.hbm %s2066_s7, %s1212_s3  ;;  %s371_s26 = scalar_lea.vmem [#allocation13], %s1211_s18 }
  0x33   : > { %1313 = dma.hbm_to_vmem [thread:$0]  (!%p1813_p5), %s330_s16, 256, %s332_s20, [#allocation12], %s2099_s0, %s2099_s0, %s2098_s23  }
  0x34   : > { %s378_s6 = sshll.u32 %s376_s25, 4  ;;  %s380_s28 = sshll.u32 %s371_s26, 4  ;;  %s379_s6 = int_to_ptr.hbm [resolvable:$true] %s378_s6  ;;  %s381_s28 = int_to_ptr.vmem [resolvable:$true] %s380_s28 }
  0x35   : > { %1320 = dma.hbm_to_vmem [thread:$0]  (!%p1868_p8), %s379_s6, 64, %s381_s28, %s349_s30  }
  0x36   : > { %389 = sbr.rel (%p1805_p3) target bundleno = 1380 (0x564), region = 52  ;;  %s391_s1 = sand.u32 (!%p1805_p3), 1, %s1797_s15  }
  0x37   : > { %s1900_s3 = sand.u32 (!%p1805_p3), 1, %s1681_s10   ;;  %s392_s0 = scalar_lea.sflag (!%p1805_p3), [#allocation6], %s391_s1 }
  0x38   : > { %s1214_s22 = sshll.u32 (!%p1805_p3), %s1900_s3, 3 }
  0x39   : > { %s395_s18 = scalar_lea.vmem (!%p1805_p3), [#allocation5], %s1214_s22 }
  0x3b   : > { %1652 = dma.done.wait (%p1839_p12), %s392_s0, 128  }
  0x3c   : > { %1654 = vsyncadd (%p1839_p12), %s392_s0, 4294967168 }
  0x3d   : > { %1656 = dma.done.wait (%p64_p1), [#allocation9], 512  }
  0x3e   : > { %1658 = vsyncadd (%p64_p1), [#allocation9], 4294966784 }
  0x3f   : > { %1660 = dma.done.wait (%p64_p1), [#allocation12], 256  }
  0x40   : > { %1662 = vsyncadd (%p64_p1), [#allocation12], 4294967040  ;;  %s1218_s19 = sshll.u32 %s1900_s3, 2 }
  0x41   : > { %s1918_s27 = scalar_lea.vmem [#allocation13], %s1218_s19 }
  0x42   : > { %1664 = dma.done.wait (%p1839_p12), %s392_s0, 64  }
  0x43   : > { %1666 = vsyncadd (%p1839_p12), %s392_s0, 4294967232  ;;  %v1278_v0 = vld [vmem:[#allocation10 + $0x8] sm:$0xff]  ;;  %s1704_s30 = smov 96   ;;  %v1277_v1 = vld [vmem:[#allocation10] sm:$0xff]  ;;  %vm493_vm0 = vcmask 261120   ;;  %vm511_vm1 = vcmask 257024  }
  0x44   : > { %532 = vrot.lane.b32.xlu0 %v1278_v0, %s1704_s30  ;;  %v1401_v2 = vld [vmem:[%s2063_s4] ss:$0 sm:$0xff]  ;;  %v1276_v3 = vld [vmem:[#allocation10 + $0x8] sm:$0xff]  ;;  %v1280_v4 = vld [vmem:[#allocation8 + $0x8] sm:$0xff]  ;;  %s1705_s20 = smov 32   ;;  %vm557_vm2 = vcmask 519424  }
  0x45   : > { %536 = vrot.lane.b32.xlu1 %v1401_v2, %s1704_s30  ;;  %503 = vmatpush.bf16.msra.mxu0 %v1276_v3  ;;  %v1275_v5 = vld [vmem:[#allocation10] sm:$0xff]  ;;  %v1279_v6 = vld [vmem:[#allocation8] sm:$0xff]  ;;  %vm607_vm3 = vcmask 64512   ;;  %s1706_s21 = smov 104   ;;  %s1707_s8 = smov 112   ;;  %vm662_vm4 = vcmask 1043456  }
  0x46   : > { %593 = vmatpush.bf16.msra.mxu2 %v1280_v4  ;;  %v471_v7 = vld [vmem:[%s395_s18] sm:$0xff]  ;;  %v1402_v11 = vld [vmem:[%s2063_s4] ss:$0 sm:$0xff]  ;;  %s1708_s25 = smov 120   ;;  %s1709_s6 = smov 88  }
  0x47   : > { %v472_v8 = vpack.c.bf16 %v471_v7, %v471_v7  ;;  %v1403_v15 = vld [vmem:[%s2061_s2] ss:$0 sm:$0xff]  ;;  %v605_v57 = vld [vmem:[%s1918_s27] sm:$0xf]  ;;  %s1710_s26 = smov 80   ;;  %s1220_s28 = sshll.u32 %s1900_s3, 5 }
  0x48   : > { %v606_v58 = vunpack.c.l.bf16 %v605_v57  ;;  %v684_v63 = vld [vmem:[%s1918_s27] sm:$0xf]  ;;  %s1973_s1 = scalar_lea.vmem [#allocation15], %s1220_s28  ;;  %s1711_s0 = smov 72  }
  0x49   : > { %504 = vmatpush.bf16.msra.mxu0 %v1275_v5  ;;  %v685_v0 = vunpack.c.l.bf16 %v684_v63  ;;  %v868_v5 = vld [vmem:[%s1918_s27] sm:$0xf]  ;;  %s1712_s18 = smov 8   ;;  %s1713_s19 = smov 24  }
  0x4a   : > { %594 = vmatpush.bf16.msra.mxu2 %v1279_v6  ;;  %v869_v6 = vunpack.c.l.bf16 %v868_v5  ;;  %s1030_s16 = sshll.u32 %s1973_s1, 4  ;;  %s1002_s11 = scalar_lea.sflag [#allocation16], %s1900_s3  ;;  %s1031_s16 = int_to_ptr.vmem [resolvable:$true] %s1030_s16 }
  0x4c   : > { %530 = vrot.lane.b32.xlu0 %v1277_v1, %s1704_s30  ;;  %1229 = vmatmul.msk.bf16.vlgmr.msra.gmra.mxu0 %vm493_vm0, %v472_v8 }
  0x4d   : > { %1247 = vmatmul.msk.bf16.vlgmr.msra.gmra.mxu2 %vm493_vm0, %v472_v8 }
  0xb6   : > { %v533_v9 = vpop.permute.xlu0 %532 }
  0xb7   : > { %545 = vmatpush.bf16.msra.mxu1 %v533_v9  ;;  %v537_v21 = vpop.permute.xlu1 %536 }
  0xbe   : > { %v531_v10 = vpop.permute.xlu0 %530 }
  0xbf   : > { %546 = vmatpush.bf16.msra.mxu1 %v531_v10  ;;  %v776_v10 = vld [vmem:[%s1918_s27] sm:$0xf]  ;;  %s1714_s27 = smov 16  }
  0xc2   : > { %1238 = vmatmul.msk.bf16.vlgmr.msra.gmra.mxu1 %vm493_vm0, %v472_v8 }
  0xc9   : > { %v506_v12 = vpop.f32.mrf.mxu0 }
  0xca   : > { %v507_v13 = vadd.f32 %v1402_v11, %v506_v12 }
  0xcc   : > { %v510_v14 = vpack.c.bf16 %v507_v13, %v507_v13  ;;  %v777_v13 = vunpack.c.l.bf16 %v776_v10 }
  0xce   : > { %512 = vst.msk [vmem:[#allocation2] sm:$0xf] %vm511_vm1, %v510_v14 }
  0xd0   : > { %v596_v16 = vpop.f32.mrf.mxu2 }
  0xd1   : > { %v508_v17 = vpop.f32.mrf.mxu0  ;;  %v597_v18 = vadd.f32 %v1403_v15, %v596_v16 }
  0xd3   : > { %v600_v19 = vpack.c.bf16 %v597_v18, %v597_v18 }
  0xd5   : > { %602 = vst.msk [vmem:[#allocation3] sm:$0xf] %vm511_vm1, %v600_v19 }
  0xd8   : > { %v598_v20 = vpop.f32.mrf.mxu2 }
  0xdc   : > { %v866_v35 = vld [vmem:[#allocation3] sm:$0xf] }
  0xdd   : > { %v682_v38 = vld [vmem:[#allocation3] sm:$0xf]  ;;  %v871_v40 = vunpack.c.l.b16 %v866_v35 }
  0xde   : > { %v603_v41 = vld [vmem:[#allocation3] sm:$0xf]  ;;  %v687_v42 = vunpack.c.l.b16 %v682_v38 }
  0xdf   : > { %v872_v43 = vpack.c.b16 %v871_v40, %v871_v40  ;;  %v774_v45 = vld [vmem:[#allocation3] sm:$0xf] }
  0xe0   : > { %v688_v44 = vpack.c.b16 %v687_v42, %v687_v42  ;;  %v779_v46 = vunpack.c.l.b16 %v774_v45 }
  0xe2   : > { %v780_v47 = vpack.c.b16 %v779_v46, %v779_v46 }
 0x13f   : > { %v548_v22 = vpop.f32.mrf.mxu1 }
 0x140   : > { %v549_v23 = vadd.f32 %v548_v22, %v537_v21 }
 0x142   : > { %v552_v24 = vpack.c.bf16 %v549_v23, %v549_v23 }
 0x144   : > { %554 = vrot.lane.b32.xlu1 %v552_v24, %s1705_s20 }
 0x147   : > { %v550_v25 = vpop.f32.mrf.mxu1 }
 0x1b6   : > { %v555_v26 = vpop.permute.xlu1 %554 }
 0x1b7   : > { %558 = vst.msk [vmem:[#allocation2] sm:$0xf] %vm557_vm2, %v555_v26 }
 0x1be   : > { %v604_v27 = vld [vmem:[#allocation2] sm:$0xf] }
 0x1bf   : > { %v867_v28 = vld [vmem:[#allocation2] sm:$0xf]  ;;  %v612_v30 = vsel %vm607_vm3, %v604_v27, 0 }
 0x1c0   : > { %v775_v29 = vld [vmem:[#allocation2] sm:$0xf]  ;;  %v876_v31 = vunpack.c.l.b16 %v867_v28  ;;  %621 = vmatpush.bf16.xpose.msra.mxu3 %v612_v30 }
 0x1c1   : > { %v784_v32 = vunpack.c.l.b16 %v775_v29  ;;  %v683_v33 = vld [vmem:[#allocation2] sm:$0xf] }
 0x1c2   : > { %v692_v34 = vunpack.c.l.b16 %v683_v33  ;;  %v877_v36 = vpack.c.b16 %v876_v31, %v876_v31  ;;  %v741_v7 = vld [vmem:[#allocation2] sm:$0xf] }
 0x1c3   : > { %v785_v37 = vpack.c.b16 %v784_v32, %v784_v32  ;;  %v744_v9 = vunpack.c.l.b16 %v741_v7 }
 0x1c4   : > { %v693_v39 = vpack.c.b16 %v692_v34, %v692_v34  ;;  %878 = vrot.lane.b32.xlu1 %v877_v36, %s1706_s21  ;;  %v833_v36 = vld [vmem:[#allocation2] sm:$0xf] }
 0x1c5   : > { %786 = vrot.lane.b32.xlu0 %v785_v37, %s1707_s8  ;;  %v745_v14 = vpack.c.b16 %v744_v9, %v744_v9 }
 0x1c6   : > { %694 = vrot.lane.b32.xlu2 %v693_v39, %s1708_s25  ;;  %v836_v39 = vunpack.c.l.b16 %v833_v36 }
 0x1c7   : > { %1248 = vmatmul.msk.bf16.vlgmr.msra.gmra.mxu3 %vm607_vm3, %v603_v41 }
 0x1c8   : > { %v837_v42 = vpack.c.b16 %v836_v39, %v836_v39 }
 0x1cd   : > { %873 = vrot.lane.b32.xlu0 %v872_v43, %s1706_s21 }
 0x1ce   : > { %689 = vrot.lane.b32.xlu2 %v688_v44, %s1708_s25 }
 0x1d6   : > { %781 = vrot.lane.b32.xlu2 %v780_v47, %s1707_s8 }
 0x220   : > { %v695_v48 = vpop.permute.xlu2 %694 }
 0x221   : > { %v700_v49 = vsel %vm607_vm3, %v695_v48, 0  ;;  %v652_v48 = vld [vmem:[#allocation2] sm:$0xf] }
 0x222   : > { %709 = vmatpush.bf16.xpose.msrb.mxu1 %v700_v49 }
 0x228   : > { %v690_v50 = vpop.permute.xlu2 %689 }
 0x229   : > { %1250 = vmatmul.msk.bf16.vlgmr.msrb.gmra.mxu1 %vm607_vm3, %v690_v50 }
 0x230   : > { %v782_v55 = vpop.permute.xlu2 %781 }
 0x236   : > { %v879_v51 = vpop.permute.xlu1 %878 }
 0x237   : > { %v787_v52 = vpop.permute.xlu0 %786  ;;  %v884_v53 = vsel %vm607_vm3, %v879_v51, 0 }
 0x238   : > { %v792_v54 = vsel %vm607_vm3, %v787_v52, 0  ;;  %893 = vmatpush.bf16.xpose.msra.mxu1 %v884_v53  ;;  %v655_v53 = vunpack.c.l.b16 %v652_v48 }
 0x239   : > { %801 = vmatpush.bf16.xpose.msrb.mxu3 %v792_v54 }
 0x23a   : > { %v656_v57 = vpack.c.b16 %v655_v53, %v655_v53 }
 0x23f   : > { %v874_v56 = vpop.permute.xlu0 %873 }
 0x240   : > { %1253 = vmatmul.msk.bf16.vlgmr.msrb.gmra.mxu3 %vm607_vm3, %v782_v55  ;;  %1256 = vmatmul.msk.bf16.vlgmr.msra.gmra.mxu1 %vm607_vm3, %v874_v56 }
 0x24a   : > { %v623_v59 = vpop.f32.mrf.mxu3 }
 0x24b   : > { %v624_v60 = vadd.f32 %v623_v59, %v606_v58 }
 0x24d   : > { %v627_v61 = vsel %vm607_vm3, %v624_v60, -inf }
 0x24e   : > { %628 = vmax.xlane.f32.xlu2 %v627_v61 }
 0x252   : > { %v625_v62 = vpop.f32.mrf.mxu3 }
 0x2a6   : > { %v711_v1 = vpop.f32.mrf.mxu1 }
 0x2a7   : > { %v712_v2 = vadd.f32 %v711_v1, %v685_v0 }
 0x2a9   : > { %v715_v3 = vsel %vm607_vm3, %v712_v2, -inf }
 0x2aa   : > { %716 = vmax.xlane.f32.xlu1 %v715_v3 }
 0x2ae   : > { %v713_v4 = vpop.f32.mrf.mxu1 }
 0x2bd   : > { %v895_v8 = vpop.f32.mrf.mxu1 }
 0x2be   : > { %v896_v11 = vadd.f32 %v895_v8, %v869_v6 }
 0x2c0   : > { %v899_v12 = vsel %vm607_vm3, %v896_v11, -inf }
 0x2c1   : > { %900 = vmax.xlane.f32.xlu0 %v899_v12  ;;  %v629_v16 = vpop.xlane.xlu2 %628 }
 0x2c2   : > { %v630_v18 = vsub.f32 %v624_v60, %v629_v16  ;;  %v925_v60 = vld [vmem:[#allocation2] sm:$0xf] }
 0x2c3   : > { %746 = vrot.lane.b32.xlu1 %v745_v14, %s1709_s6  ;;  %v803_v15 = vpop.f32.mrf.mxu3  ;;  %v928_v61 = vunpack.c.l.b16 %v925_v60  ;;  %s1591_s6 = scalar_lea.hbm %s2068_s9, 64 }
 0x2c4   : > { %v804_v17 = vadd.f32 %v803_v15, %v777_v13  ;;  %v631_v20 = vmul.f32 1.442695, %v630_v18 }
 0x2c5   : > { %v897_v19 = vpop.f32.mrf.mxu1  ;;  %v929_v62 = vpack.c.b16 %v928_v61, %v928_v61 }
 0x2c6   : > { %v807_v21 = vsel %vm607_vm3, %v804_v17, -inf  ;;  %1405 = vpow2.f32 %v631_v20 }
 0x2c7   : > { %808 = vmax.xlane.f32.xlu2 %v807_v21 }
 0x2cb   : > { %v805_v22 = vpop.f32.mrf.mxu3 }
 0x2cc   : > { %v1406_v23 = vpop.eup %1405 }
 0x2cd   : > { %v633_v24 = vsel %vm607_vm3, %v1406_v23, 0.0 }
 0x2cf   : > { %634 = vadd.xlane.f32.xlu2 %v633_v24 }
 0x31d   : > { %v717_v25 = vpop.xlane.xlu1 %716 }
 0x31e   : > { %v718_v26 = vsub.f32 %v712_v2, %v717_v25 }
 0x320   : > { %v719_v27 = vmul.f32 1.442695, %v718_v26 }
 0x322   : > { %1407 = vpow2.f32 %v719_v27 }
 0x328   : > { %v1956_v28 = vpop.eup %1407 }
 0x329   : > { %v721_v29 = vsel %vm607_vm3, %v1956_v28, 0.0 }
 0x32a   : > { %722 = vadd.xlane.f32.xlu1 %v721_v29 }
 0x334   : > { %v901_v30 = vpop.xlane.xlu0 %900 }
 0x335   : > { %v902_v31 = vsub.f32 %v896_v11, %v901_v30  ;;  %v747_v32 = vpop.permute.xlu1 %746 }
 0x336   : > { %v752_v33 = vsel %vm662_vm4, %v747_v32, 0 }
 0x337   : > { %v903_v34 = vmul.f32 1.442695, %v902_v31  ;;  %761 = vmatpush.bf16.msrb.mxu2 %v752_v33 }
 0x339   : > { %1409 = vpow2.f32 %v903_v34 }
 0x33a   : > { %v809_v35 = vpop.xlane.xlu2 %808 }
 0x33b   : > { %v810_v37 = vsub.f32 %v804_v17, %v809_v35 }
 0x33d   : > { %v811_v38 = vmul.f32 1.442695, %v810_v37 }
 0x33f   : > { %v1961_v40 = vpop.eup %1409  ;;  %1411 = vpow2.f32 %v811_v38 }
 0x340   : > { %v905_v41 = vsel %vm607_vm3, %v1961_v40, 0.0 }
 0x341   : > { %906 = vadd.xlane.f32.xlu0 %v905_v41 }
 0x342   : > { %v635_v43 = vpop.xlane.xlu2 %634 }
 0x343   : > { %838 = vrot.lane.b32.xlu1 %v837_v42, %s1710_s26  ;;  %1413 = vrcp.f32 %v635_v43  ;;  %v647_v50 = vand.u32 2147483648, %v635_v43  ;;  %v645_v52 = vand.u32 2147483647, %v635_v43  ;;  %vm641_vm6 = vweird.f32 %v635_v43 }
 0x345   : > { %v1965_v44 = vpop.eup %1411  ;;  %v648_v55 = vor.u32 1.1754944e-38, %v647_v50  ;;  %vm646_vm8 = vcmp.eq.f32.partialorder %v645_v52, 8.507059e+37 }
 0x346   : > { %v813_v45 = vsel %vm607_vm3, %v1965_v44, 0.0 }
 0x347   : > { %814 = vadd.xlane.f32.xlu2 %v813_v45 }
 0x349   : > { %v1414_v46 = vpop.eup %1413 }
 0x34a   : > { %v637_v47 = vmul.f32 %v1414_v46, %v635_v43  ;;  %vm642_vm5 = vweird.f32 %v1414_v46 }
 0x34b   : > { %vm643_vm7 = vmor %vm641_vm6, %vm642_vm5 }
 0x34c   : > { %v638_v49 = vsub.f32 1.0, %v637_v47 }
 0x34e   : > { %v639_v51 = vmul.f32 %v1414_v46, %v638_v49 }
 0x350   : > { %v640_v54 = vadd.f32 %v1414_v46, %v639_v51 }
 0x352   : > { %v644_v56 = vsel %vm643_vm7, %v1414_v46, %v640_v54 }
 0x353   : > { %v649_v58 = vsel %vm646_vm8, %v648_v55, %v644_v56  ;;  %vm864_vm8 = vcmask 191616  }
 0x354   : > { %v1971_v59 = vmul.f32 %v1406_v23, %v649_v58  ;;  %v1282_v58 = vld [vmem:[#allocation11 + $0x8] sm:$0xff] }
 0x355   : > { %657 = vrot.lane.b32.xlu0 %v656_v57, %s1704_s30  ;;  %988 = vmatpush.bf16.msra.mxu3 %v1282_v58  ;;  %s1283_s30 = sshll.u32 %s1689_s12, 5 }
 0x356   : > { %651 = vst.msk [vmem:[%s1973_s1] sm:$0xff] %vm607_vm3, %v1971_v59  ;;  %s1029_s29 = scalar_lea.hbm %s2068_s9, %s1283_s30 }
 0x357   : > { %s1032_s23 = sshll.u32 %s1029_s29, 4  ;;  %s1033_s23 = int_to_ptr.hbm [resolvable:$true] %s1032_s23 }
 0x358   : > { %s1585_s20 = sshra.s32 %s1033_s23, 4  ;;  %s1586_s20 = int_to_ptr.hbm [resolvable:$true] %s1585_s20 }
 0x359   : > { %s1587_s21 = scalar_lea.hbm %s1586_s20, 32  ;;  %p1592_p10 = scmp.lt.s32.totalorder %s1586_s20, %s2068_s9 }
 0x35a   : > { %p1588_p1 = scmp.ne.s32.totalorder %s1586_s20, %s1587_s21  ;;  %p1593_p11 = scmp.lt.s32.totalorder %s1591_s6, %s1587_s21 }
 0x35c   : > { %p1589_p3 = pnand %p1588_p1, %p1846_p4  ;;  %p1594_p12 = por %p1593_p11, %p1592_p10 }
 0x35e   : > { %p1590_p5 = pneg %p1589_p3 }
 0x35f   : > { %930 = vrot.lane.b32.xlu2 %v929_v62, %s1711_s0 }
 0x360   : > { %p1595_p13 = pnand %p1594_p12, %p1590_p5 }
 0x39d   : > { %v723_v63 = vpop.xlane.xlu1 %722 }
 0x39e   : > { %1415 = vrcp.f32 %v723_v63  ;;  %v735_v3 = vand.u32 2147483648, %v723_v63  ;;  %v733_v5 = vand.u32 2147483647, %v723_v63  ;;  %vm729_vm10 = vweird.f32 %v723_v63 }
 0x3a0   : > { %v736_v7 = vor.u32 1.1754944e-38, %v735_v3  ;;  %vm734_vm12 = vcmp.eq.f32.partialorder %v733_v5, 8.507059e+37 }
 0x3a4   : > { %v1416_v0 = vpop.eup %1415 }
 0x3a5   : > { %v725_v1 = vmul.f32 %v1416_v0, %v723_v63  ;;  %vm730_vm9 = vweird.f32 %v1416_v0 }
 0x3a6   : > { %vm731_vm11 = vmor %vm729_vm10, %vm730_vm9  ;;  %vm956_vm9 = vcmask 257216  }
 0x3a7   : > { %v726_v2 = vsub.f32 1.0, %v725_v1 }
 0x3a9   : > { %v727_v4 = vmul.f32 %v1416_v0, %v726_v2 }
 0x3ab   : > { %v728_v6 = vadd.f32 %v1416_v0, %v727_v4 }
 0x3ad   : > { %v732_v8 = vsel %vm731_vm11, %v1416_v0, %v728_v6 }
 0x3ae   : > { %v737_v9 = vsel %vm734_vm12, %v736_v7, %v732_v8 }
 0x3af   : > { %v738_v10 = vmul.f32 %v1956_v28, %v737_v9 }
 0x3b1   : > { %1251 = vst.msk [vmem:[%s1973_s1 + $0x8] sm:$0xff] %vm607_vm3, %v738_v10  ;;  %v742_v11 = vpack.c.bf16 %v738_v10, %v738_v10 }
 0x3b3   : > { %1252 = vmatmul.msk.bf16.vlgmr.msrb.gmra.mxu2 %vm607_vm3, %v742_v11 }
 0x3b4   : > { %v907_v12 = vpop.xlane.xlu0 %906 }
 0x3b5   : > { %1417 = vrcp.f32 %v907_v12  ;;  %v919_v17 = vand.u32 2147483648, %v907_v12  ;;  %v917_v19 = vand.u32 2147483647, %v907_v12  ;;  %vm913_vm14 = vweird.f32 %v907_v12  ;;  %v839_v31 = vpop.permute.xlu1 %838 }
 0x3b6   : > { %v844_v38 = vsel %vm662_vm4, %v839_v31, 0 }
 0x3b7   : > { %v920_v24 = vor.u32 1.1754944e-38, %v919_v17  ;;  %vm918_vm1 = vcmp.eq.f32.partialorder %v917_v19, 8.507059e+37 }
 0x3ba   : > { %v815_v13 = vpop.xlane.xlu2 %814 }
 0x3bb   : > { %v1418_v14 = vpop.eup %1417  ;;  %1419 = vrcp.f32 %v815_v13  ;;  %v827_v29 = vand.u32 2147483648, %v815_v13  ;;  %v825_v33 = vand.u32 2147483647, %v815_v13  ;;  %vm821_vm5 = vweird.f32 %v815_v13 }
 0x3bc   : > { %v909_v15 = vmul.f32 %v1418_v14, %v907_v12  ;;  %vm914_vm13 = vweird.f32 %v1418_v14 }
 0x3bd   : > { %vm915_vm15 = vmor %vm913_vm14, %vm914_vm13  ;;  %v828_v39 = vor.u32 1.1754944e-38, %v827_v29  ;;  %vm826_vm7 = vcmp.eq.f32.partialorder %v825_v33, 8.507059e+37 }
 0x3be   : > { %v910_v16 = vsub.f32 1.0, %v909_v15 }
 0x3c0   : > { %v911_v18 = vmul.f32 %v1418_v14, %v910_v16 }
 0x3c1   : > { %v1420_v20 = vpop.eup %1419 }
 0x3c2   : > { %v912_v21 = vadd.f32 %v1418_v14, %v911_v18  ;;  %v817_v22 = vmul.f32 %v1420_v20, %v815_v13  ;;  %v931_v23 = vpop.permute.xlu2 %930  ;;  %vm822_vm2 = vweird.f32 %v1420_v20 }
 0x3c3   : > { %v936_v25 = vsel %vm662_vm4, %v931_v23, 0  ;;  %vm823_vm6 = vmor %vm821_vm5, %vm822_vm2 }
 0x3c4   : > { %v916_v26 = vsel %vm915_vm15, %v1418_v14, %v912_v21  ;;  %v818_v27 = vsub.f32 1.0, %v817_v22  ;;  %945 = vmatpush.bf16.msra.mxu2 %v936_v25 }
 0x3c5   : > { %v921_v28 = vsel %vm918_vm1, %v920_v24, %v916_v26 }
 0x3c6   : > { %v922_v30 = vmul.f32 %v1961_v40, %v921_v28  ;;  %v819_v32 = vmul.f32 %v1420_v20, %v818_v27  ;;  %v653_v40 = vpack.c.bf16 %v1971_v59, %v1971_v59  ;;  %v1281_v59 = vld [vmem:[#allocation11] sm:$0xff] }
 0x3c7   : > { %v658_v34 = vpop.permute.xlu0 %657  ;;  %989 = vmatpush.bf16.msra.mxu3 %v1281_v59 }
 0x3c8   : > { %1257 = vst.msk [vmem:[%s1973_s1 + $0x18] sm:$0xff] %vm607_vm3, %v922_v30  ;;  %v820_v35 = vadd.f32 %v1420_v20, %v819_v32  ;;  %v664_v36 = vsel %vm662_vm4, %v658_v34, 0  ;;  %v926_v37 = vpack.c.bf16 %v922_v30, %v922_v30  ;;  %vm680_vm4 = vcmask 60416  }
 0x3c9   : > { %673 = vmatpush.bf16.msrb.mxu0 %v664_v36 }
 0x3ca   : > { %v824_v41 = vsel %vm823_vm6, %v1420_v20, %v820_v35  ;;  %1258 = vmatmul.msk.bf16.vlgmr.msra.gmra.mxu2 %vm607_vm3, %v926_v37 }
 0x3cb   : > { %v829_v42 = vsel %vm826_vm7, %v828_v39, %v824_v41 }
 0x3cc   : > { %v830_v43 = vmul.f32 %v1965_v44, %v829_v42  ;;  %1249 = vmatmul.msk.bf16.vlgmr.msrb.gmra.mxu0 %vm607_vm3, %v653_v40 }
 0x3cd   : > { %853 = vmatpush.bf16.msra.mxu0 %v844_v38 }
 0x3ce   : > { %1254 = vst.msk [vmem:[%s1973_s1 + $0x10] sm:$0xff] %vm607_vm3, %v830_v43  ;;  %v834_v45 = vpack.c.bf16 %v830_v43, %v830_v43 }
 0x3dc   : > { %1255 = vmatmul.msk.bf16.vlgmr.msra.gmra.mxu0 %vm607_vm3, %v834_v45  ;;  %vm772_vm3 = vcmask 126016  }
 0x436   : > { %v763_v46 = vpop.f32.mrf.mxu2 }
 0x437   : > { %v767_v47 = vpack.c.bf16 %v763_v46, %v763_v46 }
 0x439   : > { %769 = vrot.lane.b32.xlu0 %v767_v47, %s1712_s18 }
 0x43e   : > { %v765_v48 = vpop.f32.mrf.mxu2 }
 0x449   : > { %v675_v49 = vpop.f32.mrf.mxu0 }
 0x44a   : > { %v679_v50 = vpack.c.bf16 %v675_v49, %v675_v49 }
 0x44c   : > { %681 = vst.msk [vmem:[#allocation4] sm:$0xf] %vm680_vm4, %v679_v50 }
 0x44d   : > { %v947_v51 = vpop.f32.mrf.mxu2 }
 0x44e   : > { %v951_v52 = vpack.c.bf16 %v947_v51, %v947_v51 }
 0x450   : > { %953 = vrot.lane.b32.xlu0 %v951_v52, %s1713_s19 }
 0x451   : > { %v677_v44 = vpop.f32.mrf.mxu0 }
 0x455   : > { %v949_v53 = vpop.f32.mrf.mxu2 }
 0x459   : > { %v855_v54 = vpop.f32.mrf.mxu0 }
 0x45a   : > { %v859_v55 = vpack.c.bf16 %v855_v54, %v855_v54 }
 0x45c   : > { %861 = vrot.lane.b32.xlu1 %v859_v55, %s1714_s27 }
 0x461   : > { %v857_v56 = vpop.f32.mrf.mxu0 }
 0x4ab   : > { %v770_v57 = vpop.permute.xlu0 %769 }
 0x4ac   : > { %773 = vst.msk [vmem:[#allocation4] sm:$0xf] %vm772_vm3, %v770_v57 }
 0x4c2   : > { %v954_v61 = vpop.permute.xlu0 %953 }
 0x4ce   : > { %v862_v60 = vpop.permute.xlu1 %861 }
 0x4cf   : > { %865 = vst.msk [vmem:[#allocation4] sm:$0xf] %vm864_vm8, %v862_v60 }
 0x4d0   : > { %957 = vst.msk [vmem:[#allocation4] sm:$0xf] %vm956_vm9, %v954_v61 }
 0x4d7   : > { %v958_v62 = vld [vmem:[#allocation4] sm:$0xf] }
 0x4d8   : > { %1267 = vmatmul.msk.bf16.vlgmr.msra.gmra.mxu3 %vm493_vm0, %v958_v62 }
 0x4d9   : > { %1598 = shalt.err (!%p1595_p13)
}
 0x4da   : > { %s1715_s1 = smov 128   ;;  %s1270_s0 = sshll.u32 %s1689_s12, 3 }
 0x4db   : > { %1301 = dma.vmem_to_hbm [thread:$0]  (%p1846_p4), %s1031_s16, 512, %s1033_s23, %s1002_s11, %s1715_s1, %s1715_s1, %s1712_s18  }
 0x4dc   : > { %s2100_s30 = sld [smem:[#allocation32_spill]]  ;;  %s458_s8 = scalar_lea.vmem [#allocation14], %s1214_s22 }
 0x4dd   : > { %s2102_s21 = sld [smem:[#allocation31_spill]]  ;;  %s1015_s25 = sshll.u32 %s458_s8, 4  ;;  %s1016_s25 = int_to_ptr.vmem [resolvable:$true] %s1015_s25 }
 0x4de   : > { %s997_s12 = scalar_lea.sflag [#allocation7], %s1900_s3 }
 0x4e2   : > { %s2101_s24 = smov %s2100_s30  ;;  %s1013_s15 = scalar_lea.hbm %s2100_s30, %s1270_s0 }
 0x4e3   : > { %v1404_v63 = vld [vmem:[%s2102_s21] ss:$0 sm:$0xff]  ;;  %s1017_s6 = sshll.u32 %s1013_s15, 4  ;;  %s1619_s22 = scalar_lea.hbm %s2101_s24, 16  ;;  %s1018_s6 = int_to_ptr.hbm [resolvable:$true] %s1017_s6 }
 0x4e4   : > { %s1613_s18 = sshra.s32 %s1018_s6, 4  ;;  %s1614_s18 = int_to_ptr.hbm [resolvable:$true] %s1613_s18 }
 0x4e5   : > { %s1615_s16 = scalar_lea.hbm %s1614_s18, 8  ;;  %p1620_p8 = scmp.lt.s32.totalorder %s1614_s18, %s2101_s24 }
 0x4e6   : > { %p1616_p0 = scmp.ne.s32.totalorder %s1614_s18, %s1615_s16  ;;  %p1621_p1 = scmp.lt.s32.totalorder %s1619_s22, %s1615_s16 }
 0x4e8   : > { %p1617_p2 = pnand %p1616_p0, %p1846_p4  ;;  %p1622_p3 = por %p1621_p1, %p1620_p8 }
 0x4ea   : > { %p1618_p7 = pneg %p1617_p2 }
 0x4ec   : > { %p1623_p5 = pnand %p1622_p3, %p1618_p7 }
 0x55b   : > { %v991_v0 = vpop.f32.mrf.mxu3 }
 0x55c   : > { %v992_v1 = vadd.f32 %v1404_v63, %v991_v0 }
 0x55e   : > { %995 = vst.msk [vmem:[%s458_s8] sm:$0xff] %vm493_vm0, %v992_v1 }
 0x55f   : > { %1626 = shalt.err (!%p1623_p5)
}
 0x560   : > { %1300 = dma.vmem_to_hbm [thread:$0]  (%p1846_p4), %s1016_s25, 128, %s1018_s6, %s997_s12  }
 0x563   : > { %v993_v2 = vpop.f32.mrf.mxu3 }
 0x564 PF: > { %s2103_s3 = sld [smem:[#allocation23_spill]]  ;;  %p1322_p10 = pnand %p1208_p6, %p1854_p9 }
 0x566   : > { %p1323_p11 = pneg %p1322_p10 }
 0x56a   : > { %s1047_s0 = sand.u32 1, %s2103_s3  }
 0x56b   : > { %s1048_s19 = scalar_lea.sflag [#allocation7], %s1047_s0 }
 0x56c   : > { %1668 = dma.done.wait (%p1323_p11), %s1048_s19, 128  }
 0x56d   : > { %1670 = vsyncadd (%p1323_p11), %s1048_s19, 4294967168  ;;  %s1058_s27 = scalar_lea.sflag [#allocation16], %s1047_s0 }
 0x56e   : > { %1672 = dma.done.wait (%p1323_p11), %s1058_s27, 512  }
 0x56f   : > { %1674 = vsyncadd (%p1323_p11), %s1058_s27, 4294966784  ;;  %s31_s14 = sadd.s32 1, %s1697_s14   ;;  %s2105_s17 = sld [smem:[#allocation24_spill]] }
 0x570   : > { %p28_p12 = scmp.ge.s32.totalorder %s31_s14, 4   ;;  %s2106_s11 = sld [smem:[#allocation26_spill]] }
 0x571   : > { %s2107_s15 = sld [smem:[#allocation25_spill]]  ;;  %s2108_s30 = smov %s1681_s10 }
 0x572   : > { %s2110_s12 = smov %s1693_s13 }
 0x573   :  { %30 = sbr.rel (!%p28_p12) target bundleno = 16 (0x10), region = 145 }
 0x575   : > { %s2109_s10 = smov %s2105_s17 }
 0x577   : > { %s2111_s13 = smov %s2107_s15 }
 0x578   :  { %1064 = vsyncpa [#allocation6], 1 }
 0x579   :  { %1066 = vsyncpa [#allocation6 + $0x1], 1 }
 0x57a   :  { %1067 = vsyncpa [#allocation9], 1 }
 0x57b   :  { %1068 = vsyncpa [#allocation12], 1 }
 0x57c   :  { %1069 = vsyncpa [#allocation7], 1 }
 0x57d   :  { %1071 = vsyncpa [#allocation7 + $0x1], 1 }
 0x57e   :  { %1072 = vsyncpa [#allocation16], 1 }
 0x57f   :  { %1074 = vsyncpa [#allocation16 + $0x1], 1 }

</bundles_post_ra>
